<compile_context>
chip_gen: v7x
topology: tpu7x:2x2x1
jax: 0.10.0
libtpu: 0.0.40
codegen_flags: <defaults>
</compile_context>

<pallas_src>
import functools

import jax
import jax.numpy as jnp
from jax.experimental import pallas as pl
from jax.experimental.pallas import tpu as pltpu


def _conv_row_toeplitz_kernel(x_ref, w_ref, b_ref, o_ref, xpad_ref, *, H, KH, pad):
    """One image per grid step.

    x_ref:    (1, H, W*Cin)        bf16 input rows (channels innermost)
    w_ref:    (KH, W*Cin, W*Cout)  bf16 row-Toeplitz weight (KW + width-pad folded in)
    b_ref:    (1, W*Cout)          f32 bias, tiled per output column
    o_ref:    (1, H, W*Cout)       output slab (lane-dense)
    xpad_ref: (H+KH-1, W*Cin)      bf16 scratch: input with zero height-halo
    """
    wcin = xpad_ref.shape[1]
    # Zero only the height-halo rows; interior is overwritten every step.
    # Done unconditionally (not pl.when(step==0)) so per-core scratch stays
    # valid when the batch grid axis is sharded across TensorCores.
    if pad > 0:
        xpad_ref[0:pad, :] = jnp.zeros((pad, wcin), xpad_ref.dtype)
        xpad_ref[pad + H:, :] = jnp.zeros((KH - 1 - pad, wcin), xpad_ref.dtype)
    xpad_ref[pad:pad + H, :] = x_ref[0]

    # f32 accumulator initialized with the row-broadcast bias (epilogue add fused).
    acc = jnp.broadcast_to(b_ref[...], o_ref.shape[1:]).astype(jnp.float32)
    for kh in range(KH):
        acc = acc + jnp.dot(
            xpad_ref[kh:kh + H, :],        # (H, W*Cin) row-shifted slab
            w_ref[kh],                     # (W*Cin, W*Cout)
            preferred_element_type=jnp.float32,
        )

    # Identity activation (StraightThrough); single lane-dense store.
    o_ref[0] = acc.astype(o_ref.dtype)


def quant_layer_forward(x_nchw, weight_oihw, bias=None, *, padding=1,
                        compute_dtype=jnp.bfloat16):
    """Forward of QuantLayer(org_module=Conv2d(...)) with quantization off.

    x_nchw:      (N, Cin, H, W)     float32
    weight_oihw: (Cout, Cin, KH, KW)
    bias:        (Cout,) or None
    returns      (N, Cout, H, W)    (stride=1, dilation=1, groups=1, 'same' pad)
    """
    N, Cin, H, W = x_nchw.shape
    Cout, Cin_w, KH, KW = weight_oihw.shape
    assert Cin == Cin_w
    pad = int(padding)
    # Scope: stride=1 / dilation=1 / groups=1 / symmetric 'same' padding only.
    assert 2 * pad == KH - 1 and 2 * pad == KW - 1, "stride=1 'same' conv only"

    # ---- layout glue (XLA): NCHW -> (N, H, W*Cin) row slabs, channels innermost.
    x_rows = jnp.transpose(x_nchw, (0, 2, 3, 1)).reshape(N, H, W * Cin)
    x_rows = x_rows.astype(compute_dtype)

    # ---- build the row-Toeplitz weight T: (KH, W*Cin, W*Cout).
    # T[kh, s*Cin+ci, w*Cout+co] = weight[co, ci, kh, s-w+pad] when 0<=s-w+pad<KW,
    # else 0 -> absorbs the KW taps AND the width zero-padding into the matmul.
    w_hwio = jnp.transpose(weight_oihw, (2, 3, 1, 0)).astype(jnp.float32)  # (KH,KW,Cin,Cout)
    s_idx = jnp.arange(W)[None, :, None]
    w_idx = jnp.arange(W)[None, None, :]
    k_idx = jnp.arange(KW)[:, None, None]
    sel = (s_idx == w_idx + k_idx - pad).astype(jnp.float32)               # (KW, W, W)
    T = jnp.einsum("ksw,hkic->hsiwc", sel, w_hwio)                         # (KH,W,Cin,W,Cout)
    T = T.reshape(KH, W * Cin, W * Cout).astype(compute_dtype)

    # ---- bias tiled to one value per output column (w*Cout + co).
    if bias is None:
        b_row = jnp.zeros((1, W * Cout), jnp.float32)
    else:
        b_row = jnp.tile(bias.astype(jnp.float32), (W,)).reshape(1, W * Cout)

    out_dtype = x_nchw.dtype
    kernel = functools.partial(_conv_row_toeplitz_kernel, H=H, KH=KH, pad=pad)

    flops = 2 * N * H * W * Cin * Cout * KH * KW
    bytes_accessed = (
        x_rows.size * jnp.dtype(compute_dtype).itemsize
        + T.size * jnp.dtype(compute_dtype).itemsize
        + b_row.size * 4
        + N * H * W * Cout * jnp.dtype(out_dtype).itemsize
    )

    out_rows = pl.pallas_call(
        kernel,
        out_shape=jax.ShapeDtypeStruct((N, H, W * Cout), out_dtype),
        grid_spec=pltpu.PrefetchScalarGridSpec(
            num_scalar_prefetch=0,
            grid=(N,),
            in_specs=[
                pl.BlockSpec((1, H, W * Cin), lambda n: (n, 0, 0)),
                pl.BlockSpec((KH, W * Cin, W * Cout), lambda n: (0, 0, 0)),
                pl.BlockSpec((1, W * Cout), lambda n: (0, 0)),
            ],
            out_specs=pl.BlockSpec((1, H, W * Cout), lambda n: (n, 0, 0)),
            scratch_shapes=[pltpu.VMEM((H + KH - 1, W * Cin), compute_dtype)],
        ),
        compiler_params=pltpu.CompilerParams(
            dimension_semantics=("parallel",),
        ),
        cost_estimate=pl.CostEstimate(
            flops=flops, transcendentals=0, bytes_accessed=bytes_accessed),
    )(x_rows, T, b_row)

    # Back to the PyTorch NCHW contract.
    out_nhwc = out_rows.reshape(N, H, W, Cout)
    return jnp.transpose(out_nhwc, (0, 3, 1, 2))


if __name__ == "__main__":
    # Deterministic synthetic parameters: Conv2d(4 -> 8, kernel 3, stride 1, pad 1).
    key = jax.random.PRNGKey(0)
    kx, kw, kb = jax.random.split(key, 3)

    N, Cin, H, W = 2, 4, 16, 16
    Cout, KH, KW = 8, 3, 3

    x = jax.random.normal(kx, (N, Cin, H, W), dtype=jnp.float32)
    fan_in = Cin * KH * KW
    bound = 1.0 / (fan_in ** 0.5)
    weight = jax.random.uniform(kw, (Cout, Cin, KH, KW), jnp.float32, -bound, bound)
    bias = jax.random.uniform(kb, (Cout,), jnp.float32, -bound, bound)

    fwd = jax.jit(lambda a, b, c: quant_layer_forward(a, b, c, padding=1))
    out = jax.block_until_ready(fwd(x, weight, bias))
    assert out.shape == (N, Cout, H, W)

    # Reference: same bf16-rounded inputs, exact f32 accumulation (matches the
    # kernel's bf16-in / f32-accumulate MXU path up to summation order).
    x_bf = x.astype(jnp.bfloat16).astype(jnp.float32)
    w_bf = weight.astype(jnp.bfloat16).astype(jnp.float32)
    ref = jax.lax.conv_general_dilated(
        x_bf, w_bf, window_strides=(1, 1), padding=((1, 1), (1, 1)),
        dimension_numbers=("NCHW", "OIHW", "NCHW"),
        precision=jax.lax.Precision.HIGHEST,
    ) + bias.reshape(1, Cout, 1, 1)

    assert jnp.allclose(out, ref, atol=1e-3, rtol=1e-3), (
        float(jnp.max(jnp.abs(out - ref))))

    print("KERNEL_OK")
</pallas_src>

<mosaic_0001>
module attributes {stable_mosaic.version = 11 : i64} {
  func.func @_conv_row_toeplitz_kernel(%arg0: i32, %arg1: memref<1x16x64xbf16, #tpu.memory_space<vmem>>, %arg2: memref<3x64x128xbf16, #tpu.memory_space<vmem>>, %arg3: memref<1x128xf32, #tpu.memory_space<vmem>>, %arg4: memref<1x16x128xf32, #tpu.memory_space<vmem>>, %arg5: memref<18x64xbf16, #tpu.memory_space<vmem>>) attributes {dimension_semantics = [#tpu.dimension_semantics<parallel>], iteration_bounds = array<i64: 2>, scalar_prefetch = 0 : i64, scratch_operands = 1 : i64, tpu.core_type = #tpu.core_type<tc>, window_params = [{transform_indices = @transform_0, window_bounds = array<i64: 1, 16, 64>}, {pipeline_mode = #tpu.pipeline_mode<synchronous>, transform_indices = @transform_1, window_bounds = array<i64: 3, 64, 128>}, {pipeline_mode = #tpu.pipeline_mode<synchronous>, transform_indices = @transform_2, window_bounds = array<i64: 1, 128>}, {transform_indices = @transform_3, window_bounds = array<i64: 1, 16, 128>}]} {
    %cst = arith.constant 0.000000e+00 : bf16
    %0 = vector.broadcast %cst : bf16 to vector<1x64xbf16>
    %c0 = arith.constant 0 : index
    %c0_0 = arith.constant 0 : index
    %1 = vector.load %arg5[%c0, %c0_0] : memref<18x64xbf16, #tpu.memory_space<vmem>>, vector<1x64xbf16>
    tpu.vector_store %arg5[%c0, %c0_0], %0 {strides = array<i32>} : memref<18x64xbf16, #tpu.memory_space<vmem>>, vector<1x64xbf16>,
    %cst_1 = arith.constant 0.000000e+00 : bf16
    %2 = vector.broadcast %cst_1 : bf16 to vector<1x64xbf16>
    %c17 = arith.constant 17 : index
    %c0_2 = arith.constant 0 : index
    %3 = vector.load %arg5[%c17, %c0_2] : memref<18x64xbf16, #tpu.memory_space<vmem>>, vector<1x64xbf16>
    tpu.vector_store %arg5[%c17, %c0_2], %2 {strides = array<i32>} : memref<18x64xbf16, #tpu.memory_space<vmem>>, vector<1x64xbf16>,
    %c0_3 = arith.constant 0 : index
    %c0_4 = arith.constant 0 : index
    %c0_5 = arith.constant 0 : index
    %4 = vector.load %arg1[%c0_3, %c0_4, %c0_5] : memref<1x16x64xbf16, #tpu.memory_space<vmem>>, vector<1x16x64xbf16>
    %5 = vector.shape_cast %4 : vector<1x16x64xbf16> to vector<16x64xbf16>
    %c1 = arith.constant 1 : index
    %c0_6 = arith.constant 0 : index
    %6 = vector.load %arg5[%c1, %c0_6] : memref<18x64xbf16, #tpu.memory_space<vmem>>, vector<16x64xbf16>
    tpu.vector_store %arg5[%c1, %c0_6], %5 {strides = array<i32>} : memref<18x64xbf16, #tpu.memory_space<vmem>>, vector<16x64xbf16>,
    %c0_7 = arith.constant 0 : index
    %c0_8 = arith.constant 0 : index
    %7 = vector.load %arg3[%c0_7, %c0_8] : memref<1x128xf32, #tpu.memory_space<vmem>>, vector<1x128xf32>
    %8 = vector.shape_cast %7 : vector<1x128xf32> to vector<1x128xf32>
    %9 = vector.broadcast %8 : vector<1x128xf32> to vector<16x128xf32>
    %c0_9 = arith.constant 0 : index
    %c0_10 = arith.constant 0 : index
    %10 = vector.load %arg5[%c0_9, %c0_10] : memref<18x64xbf16, #tpu.memory_space<vmem>>, vector<16x64xbf16>
    %c0_11 = arith.constant 0 : index
    %c0_12 = arith.constant 0 : index
    %c0_13 = arith.constant 0 : index
    %11 = vector.load %arg2[%c0_11, %c0_12, %c0_13] : memref<3x64x128xbf16, #tpu.memory_space<vmem>>, vector<1x64x128xbf16>
    %12 = vector.shape_cast %11 : vector<1x64x128xbf16> to vector<64x128xbf16>
    %cst_14 = arith.constant dense<0.000000e+00> : vector<16x128xf32>
    %13 = tpu.matmul %10, %12, %cst_14 {dimension_numbers = #tpu.dot_dimension_numbers<[1], [0], [0], [1], [0, 0, 1, 1], [], []>} : vector<16x64xbf16>, vector<64x128xbf16>, vector<16x128xf32> -> vector<16x128xf32>
    %14 = arith.addf %9, %13 : vector<16x128xf32>
    %c1_15 = arith.constant 1 : index
    %c0_16 = arith.constant 0 : index
    %15 = vector.load %arg5[%c1_15, %c0_16] : memref<18x64xbf16, #tpu.memory_space<vmem>>, vector<16x64xbf16>
    %c1_17 = arith.constant 1 : index
    %c0_18 = arith.constant 0 : index
    %c0_19 = arith.constant 0 : index
    %16 = vector.load %arg2[%c1_17, %c0_18, %c0_19] : memref<3x64x128xbf16, #tpu.memory_space<vmem>>, vector<1x64x128xbf16>
    %17 = vector.shape_cast %16 : vector<1x64x128xbf16> to vector<64x128xbf16>
    %cst_20 = arith.constant dense<0.000000e+00> : vector<16x128xf32>
    %18 = tpu.matmul %15, %17, %cst_20 {dimension_numbers = #tpu.dot_dimension_numbers<[1], [0], [0], [1], [0, 0, 1, 1], [], []>} : vector<16x64xbf16>, vector<64x128xbf16>, vector<16x128xf32> -> vector<16x128xf32>
    %19 = arith.addf %14, %18 : vector<16x128xf32>
    %c2 = arith.constant 2 : index
    %c0_21 = arith.constant 0 : index
    %20 = vector.load %arg5[%c2, %c0_21] : memref<18x64xbf16, #tpu.memory_space<vmem>>, vector<16x64xbf16>
    %c2_22 = arith.constant 2 : index
    %c0_23 = arith.constant 0 : index
    %c0_24 = arith.constant 0 : index
    %21 = vector.load %arg2[%c2_22, %c0_23, %c0_24] : memref<3x64x128xbf16, #tpu.memory_space<vmem>>, vector<1x64x128xbf16>
    %22 = vector.shape_cast %21 : vector<1x64x128xbf16> to vector<64x128xbf16>
    %cst_25 = arith.constant dense<0.000000e+00> : vector<16x128xf32>
    %23 = tpu.matmul %20, %22, %cst_25 {dimension_numbers = #tpu.dot_dimension_numbers<[1], [0], [0], [1], [0, 0, 1, 1], [], []>} : vector<16x64xbf16>, vector<64x128xbf16>, vector<16x128xf32> -> vector<16x128xf32>
    %24 = arith.addf %19, %23 : vector<16x128xf32>
    %c0_26 = arith.constant 0 : index
    %c0_27 = arith.constant 0 : index
    %c0_28 = arith.constant 0 : index
    %25 = vector.load %arg4[%c0_26, %c0_27, %c0_28] : memref<1x16x128xf32, #tpu.memory_space<vmem>>, vector<1x16x128xf32>
    %26 = vector.shape_cast %25 : vector<1x16x128xf32> to vector<16x128xf32>
    %27 = vector.shape_cast %24 : vector<16x128xf32> to vector<1x16x128xf32>
    tpu.vector_store %arg4[%c0_26, %c0_27, %c0_28], %27 {strides = array<i32>} : memref<1x16x128xf32, #tpu.memory_space<vmem>>, vector<1x16x128xf32>,
    return
  }
  func.func @transform_0(%arg0: i32) -> (i32, i32, i32) {
    %c0_i32 = arith.constant 0 : i32
    %c0_i32_0 = arith.constant 0 : i32
    %c0_i32_1 = arith.constant 0 : i32
    return %arg0, %c0_i32, %c0_i32_0 : i32, i32, i32
  }
  func.func @transform_1(%arg0: i32) -> (i32, i32, i32) {
    %c0_i32 = arith.constant 0 : i32
    %c0_i32_0 = arith.constant 0 : i32
    %c0_i32_1 = arith.constant 0 : i32
    %c0_i32_2 = arith.constant 0 : i32
    return %c0_i32, %c0_i32_0, %c0_i32_1 : i32, i32, i32
  }
  func.func @transform_2(%arg0: i32) -> (i32, i32) {
    %c0_i32 = arith.constant 0 : i32
    %c0_i32_0 = arith.constant 0 : i32
    %c0_i32_1 = arith.constant 0 : i32
    return %c0_i32, %c0_i32_0 : i32, i32
  }
  func.func @transform_3(%arg0: i32) -> (i32, i32, i32) {
    %c0_i32 = arith.constant 0 : i32
    %c0_i32_0 = arith.constant 0 : i32
    %c0_i32_1 = arith.constant 0 : i32
    return %arg0, %c0_i32, %c0_i32_0 : i32, i32, i32
  }
}

</mosaic_0001>

<bundles_post_ra>
// kernel: tile.8
= control target key start
LH: loop header
LB: loop body
LE: loop exit
PB: predicated region body
PF: predicated region fallthrough
CT: control target
= control target key end

     0   :  { %s28_s0 = inlined_call_operand.vmem [shape: f32[8], index: 0, kind: input, shape index: {}]   ;;  %s29_s1 = inlined_call_operand.vmem [shape: f32[16,8], index: 1, kind: output, shape index: {}]  }
   0x1   :  { %v4_v0 = vld [vmem:[%s28_s0] ss:$0 sm:$0xff] }
   0x2   :  { %5 = vst [vmem:[%s29_s1] sm:$0xff] %v4_v0  ;;  %8 = vst [vmem:[%s29_s1 + $0x8] sm:$0xff] %v4_v0 }

// kernel: tile.9
= control target key start
LH: loop header
LB: loop body
LE: loop exit
PB: predicated region body
PF: predicated region fallthrough
CT: control target
= control target key end

     0   :  { %s131_s10 = smov 120   ;;  %s132_s11 = smov 104   ;;  %vm3_vm0 = vcmask 64512   ;;  %vm9_vm1 = vcmask 1048512   ;;  %vm15_vm2 = vcmask 982912   ;;  %vm21_vm3 = vcmask 917312   ;;  %s207_s0 = inlined_call_operand.vmem [shape: f32[16,8], index: 0, kind: input, shape index: {}]   ;;  %s208_s1 = inlined_call_operand.vmem [shape: f32[1,128], index: 1, kind: output, shape index: {}]  }
   0x1   :  { %v101_v0 = vld [vmem:[%s207_s0 + $0xf] sm:$0x1]   ;;  %v103_v1 = vld [vmem:[%s207_s0 + $0xd] sm:$0x1]   ;;  %v102_v2 = vld [vmem:[%s207_s0 + $0xe] sm:$0x1]  }
   0x2   :  { %7 = vrot.lane.b32.xlu0 %v101_v0, %s131_s10  ;;  %19 = vrot.lane.b32.xlu1 %v103_v1, %s132_s11  ;;  %v104_v3 = vld [vmem:[%s207_s0 + $0xc] sm:$0x1]   ;;  %s133_s16 = smov 112   ;;  %s134_s17 = smov 96   ;;  %v105_v4 = vld [vmem:[%s207_s0 + $0xb] sm:$0x1]  }
   0x3   :  { %v106_v5 = vld [vmem:[%s207_s0 + $0xa] sm:$0x1]   ;;  %v2_v6 = vld [vmem:[%s207_s0] sm:$0x1]   ;;  %s135_s24 = smov 88   ;;  %s136_s25 = smov 80  }
   0x4   :  { %4 = vst.msk [vmem:[#allocation0] sm:$0x1] %vm3_vm0, %v2_v6   ;;  %v107_v7 = vld [vmem:[%s207_s0 + $0x9] sm:$0x1]   ;;  %v108_v8 = vld [vmem:[%s207_s0 + $0x8] sm:$0x1]  }
   0x5   :  { %s137_s30 = smov 72   ;;  %s138_s2 = smov 64   ;;  %v109_v9 = vld [vmem:[%s207_s0 + $0x7] sm:$0x1]   ;;  %v110_v10 = vld [vmem:[%s207_s0 + $0x6] sm:$0x1]  }
   0x6   :  { %13 = vrot.lane.b32.xlu0 %v102_v2, %s133_s16  ;;  %25 = vrot.lane.b32.xlu1 %v104_v3, %s134_s17  ;;  %s139_s7 = smov 56   ;;  %s140_s8 = smov 48   ;;  %v111_v11 = vld [vmem:[%s207_s0 + $0x5] sm:$0x1]   ;;  %v112_v12 = vld [vmem:[%s207_s0 + $0x4] sm:$0x1]  }
   0x7   :  { %s141_s13 = smov 40   ;;  %s142_s14 = smov 32   ;;  %v113_v13 = vld [vmem:[%s207_s0 + $0x3] sm:$0x1]   ;;  %v114_v14 = vld [vmem:[%s207_s0 + $0x2] sm:$0x1]  }
   0x8   :  { %s143_s19 = smov 24   ;;  %s144_s20 = smov 16   ;;  %v115_v15 = vld [vmem:[%s207_s0 + $0x1] sm:$0x1]   ;;  %vm27_vm4 = vcmask 851712   ;;  %vm33_vm5 = vcmask 786112  }
   0x9   :  { %s145_s0 = smov 8   ;;  %vm39_vm6 = vcmask 720512   ;;  %vm45_vm7 = vcmask 654912   ;;  %vm51_vm8 = vcmask 589312   ;;  %vm57_vm9 = vcmask 523712  }
   0xa   :  { %31 = vrot.lane.b32.xlu0 %v105_v4, %s135_s24  ;;  %37 = vrot.lane.b32.xlu1 %v106_v5, %s136_s25  ;;  %vm63_vm10 = vcmask 458112   ;;  %vm69_vm11 = vcmask 392512   ;;  %vm75_vm12 = vcmask 326912   ;;  %vm81_vm13 = vcmask 261312  }
   0xb   :  { %vm87_vm14 = vcmask 195712   ;;  %vm93_vm15 = vcmask 130112  }
   0xe   :  { %43 = vrot.lane.b32.xlu0 %v107_v7, %s137_s30  ;;  %49 = vrot.lane.b32.xlu1 %v108_v8, %s138_s2 }
  0x12   :  { %55 = vrot.lane.b32.xlu0 %v109_v9, %s139_s7  ;;  %61 = vrot.lane.b32.xlu1 %v110_v10, %s140_s8 }
  0x16   :  { %67 = vrot.lane.b32.xlu0 %v111_v11, %s141_s13  ;;  %73 = vrot.lane.b32.xlu1 %v112_v12, %s142_s14 }
  0x1a   :  { %79 = vrot.lane.b32.xlu0 %v113_v13, %s143_s19  ;;  %85 = vrot.lane.b32.xlu1 %v114_v14, %s144_s20 }
  0x1e   :  { %91 = vrot.lane.b32.xlu0 %v115_v15, %s145_s0 }
  0x74   :  { %v8_v16 = vpop.permute.xlu0 %7   ;;  %v20_v17 = vpop.permute.xlu1 %19  }
  0x75   :  { %10 = vst.msk [vmem:[#allocation0] sm:$0x1] %vm9_vm1, %v8_v16  }
  0x78   :  { %v14_v18 = vpop.permute.xlu0 %13   ;;  %v26_v19 = vpop.permute.xlu1 %25  }
  0x79   :  { %16 = vst.msk [vmem:[#allocation0] sm:$0x1] %vm15_vm2, %v14_v18  }
  0x7a   :  { %22 = vst.msk [vmem:[#allocation0] sm:$0x1] %vm21_vm3, %v20_v17  }
  0x7b   :  { %28 = vst.msk [vmem:[#allocation0] sm:$0x1] %vm27_vm4, %v26_v19  }
  0x7c   :  { %v32_v20 = vpop.permute.xlu0 %31   ;;  %v38_v21 = vpop.permute.xlu1 %37  }
  0x7d   :  { %34 = vst.msk [vmem:[#allocation0] sm:$0x1] %vm33_vm5, %v32_v20  }
  0x7e   :  { %40 = vst.msk [vmem:[#allocation0] sm:$0x1] %vm39_vm6, %v38_v21  }
  0x80   :  { %v44_v22 = vpop.permute.xlu0 %43   ;;  %v50_v23 = vpop.permute.xlu1 %49  }
  0x81   :  { %46 = vst.msk [vmem:[#allocation0] sm:$0x1] %vm45_vm7, %v44_v22  }
  0x82   :  { %52 = vst.msk [vmem:[#allocation0] sm:$0x1] %vm51_vm8, %v50_v23  }
  0x84   :  { %v56_v24 = vpop.permute.xlu0 %55   ;;  %v62_v25 = vpop.permute.xlu1 %61  }
  0x85   :  { %58 = vst.msk [vmem:[#allocation0] sm:$0x1] %vm57_vm9, %v56_v24  }
  0x86   :  { %64 = vst.msk [vmem:[#allocation0] sm:$0x1] %vm63_vm10, %v62_v25  }
  0x88   :  { %v68_v26 = vpop.permute.xlu0 %67   ;;  %v74_v27 = vpop.permute.xlu1 %73  }
  0x89   :  { %70 = vst.msk [vmem:[#allocation0] sm:$0x1] %vm69_vm11, %v68_v26  }
  0x8a   :  { %76 = vst.msk [vmem:[#allocation0] sm:$0x1] %vm75_vm12, %v74_v27  }
  0x8c   :  { %v80_v28 = vpop.permute.xlu0 %79   ;;  %v86_v29 = vpop.permute.xlu1 %85  }
  0x8d   :  { %82 = vst.msk [vmem:[#allocation0] sm:$0x1] %vm81_vm13, %v80_v28  }
  0x8e   :  { %88 = vst.msk [vmem:[#allocation0] sm:$0x1] %vm87_vm14, %v86_v29  }
  0x90   :  { %v92_v30 = vpop.permute.xlu0 %91  }
  0x91   :  { %94 = vst.msk [vmem:[#allocation0] sm:$0x1] %vm93_vm15, %v92_v30  }
  0x98   :  { %v98_v31 = vld [vmem:[#allocation0] sm:$0x1] }
  0x99   :  { %100 = vst [vmem:[%s208_s1] sm:$0x1] %v98_v31 }

// kernel: _lambda_.1
= control target key start
LH: loop header
LB: loop body
LE: loop exit
PB: predicated region body
PF: predicated region fallthrough
CT: control target
= control target key end

     0   :  { %s721_s12 = smov 0   ;;  %s819_s0 = inlined_call_operand.vmem [shape: bf16[2,16,64], index: 0, kind: input, shape index: {}]   ;;  %s820_s1 = inlined_call_operand.vmem [shape: bf16[3,64,128], index: 1, kind: input, shape index: {}]   ;;  %s821_s2 = inlined_call_operand.vmem [shape: f32[1,128], index: 2, kind: input, shape index: {}]   ;;  %s822_s3 = inlined_call_operand.vmem [shape: f32[2,16,128], index: 3, kind: output, shape index: {}]  }
   0x1 LB: > { %s557_s13 = sadd.s32 4294967295, %s697_s12   ;;  %p561_p0 = scmp.ge.s32.totalorder %s697_s12, 1  ;;  %s697_s12 = sphi %s721_s12, %s13_s12  }
   0x2   : > { %p137_p1 = scmp.lt.s32.totalorder %s697_s12, 3 }
   0x4   : > { %p138_p2 = pnand %p561_p0, %p137_p1 }
   0x5   : > { %v675_v0 = vld [vmem:[%s820_s1 + $0x20] sm:$0xff] (!%p138_p2)   ;;  %v699_v1 = vmov (!%p138_p2), 0.0   ;;  %v676_v2 = vld [vmem:[%s820_s1 + $0x28] sm:$0xff] (!%p138_p2)   ;;  %vm700_vm0 = vmmov (!%p138_p2), 0   ;;  %p161_p3 = scmp.lt.s32.totalorder (!%p138_p2), %s557_s13, 1  ;;  %vm172_vm1 = vcmask (!%p138_p2), 516096  }
   0x6   : > { %141 = sbr.rel (%p138_p2) target bundleno = 274 (0x112), region = 32  ;;  %633 = vmatprep.subr.bf16.mxu0 (!%p138_p2), %v699_v1  ;;  %621 = vmatprep.subr.bf16.mxu1 (!%p138_p2), %v699_v1  ;;  %v678_v3 = vld [vmem:[%s820_s1] sm:$0xff] (!%p138_p2)   ;;  %v680_v4 = vld [vmem:[%s820_s1 + $0x8] sm:$0xff] (!%p138_p2)   ;;  %v677_v5 = vld [vmem:[%s820_s1 + $0x30] sm:$0xff] (!%p138_p2)   ;;  %vm173_vm2 = vsmask.f32 (!%p138_p2), 256 }
   0x7   : > { %634 = vmatpush3.bf16.msra.mxu0 (!%p138_p2), %v675_v0  ;;  %641 = vmatprep.mubr.msk.bf16.mxu0 (!%p138_p2), %vm700_vm0, %v699_v1  ;;  %v175_v6 = vld [vmem:[#allocation2] sm:$0x1] (!%p138_p2)  ;;  %vm761_vm3 = vmand (!%p138_p2), %vm172_vm1, %vm173_vm2  ;;  %vm178_vm4 = vsmask.f32 (!%p138_p2), 7938  ;;  %v180_v8 = vld [vmem:[#allocation2 + $0x8] sm:$0x1] (!%p138_p2) }
   0x8   : > { %635 = vmatprep.subr.bf16.mxu0 (!%p138_p2), %v699_v1  ;;  %629 = vmatprep.mubr.msk.bf16.mxu1 (!%p138_p2), %vm700_vm0, %v699_v1  ;;  %vm185_vm5 = vsmask.f32 (!%p138_p2), 4368  ;;  %v176_v9 = vsel (!%p138_p2), %vm761_vm3, 0, %v175_v6  ;;  %vm179_vm6 = vmand (!%p138_p2), %vm172_vm1, %vm178_vm4  ;;  %v679_v16 = vld [vmem:[%s820_s1 + $0x38] sm:$0xff] (!%p138_p2)   ;;  %vm207_vm7 = vcmask (!%p138_p2), 519168   ;;  %v684_v20 = vld [vmem:[%s820_s1 + $0x10] sm:$0xff] (!%p138_p2)  }
   0x9   : > { %622 = vmatpush3.bf16.msra.mxu1 (!%p138_p2), %v678_v3  ;;  %177 = vst [vmem:[#allocation2] sm:$0x1] (!%p138_p2), %v176_v9  ;;  %v181_v12 = vsel (!%p138_p2), %vm179_vm6, 0, %v180_v8  ;;  %vm186_vm8 = vmor (!%p138_p2), %vm173_vm2, %vm185_vm5  ;;  %v686_v25 = vld [vmem:[%s820_s1 + $0x18] sm:$0xff] (!%p138_p2)   ;;  %vm263_vm10 = vcmask (!%p138_p2), 523264   ;;  %v683_v42 = vld [vmem:[%s820_s1 + $0x40] sm:$0xff] (!%p138_p2)  }
   0xa   : > { %623 = vmatprep.subr.bf16.mxu1 (!%p138_p2), %v699_v1  ;;  %182 = vst [vmem:[#allocation2 + $0x8] sm:$0x1] (!%p138_p2), %v181_v12  ;;  %vm208_vm9 = vmand (!%p138_p2), %vm207_vm7, %vm178_vm4  ;;  %vm330_vm11 = vsmask.f32 (!%p138_p2), 7424  ;;  %v685_v44 = vld [vmem:[%s820_s1 + $0x48] sm:$0xff] (!%p138_p2)   ;;  %v687_v46 = vld [vmem:[%s820_s1 + $0x50] sm:$0xff] (!%p138_p2)  }
   0xb   : > { %636 = vmatpush3.bf16.msra.mxu0 (!%p138_p2), %v676_v2  ;;  %v689_v48 = vld [vmem:[%s820_s1 + $0x58] sm:$0xff] (!%p138_p2)   ;;  %vm426_vm12 = vcmask (!%p138_p2), 1046528   ;;  %v566_v56 = vld [vmem:[%s821_s2] ss:$0 sm:$0xff] (!%p138_p2) }
   0xc   : > { %637 = vmatprep.subr.bf16.mxu0 (!%p138_p2), %v699_v1 }
   0xd   : > { %s826_s13 = smov (!%p161_p3, %s557_s13), 1  ;;  %624 = vmatpush3.bf16.msra.mxu1 %v680_v4 }
   0xe   : > { %s604_s24 = sshll.u32 %s826_s13, 3  ;;  %625 = vmatprep.subr.bf16.mxu1 %v699_v1  ;;  %s605_s19 = sshll.u32 %s826_s13, 4 }
   0xf   : > { %s165_s27 = scalar_lea.vmem %s819_s0, %s604_s24  ;;  %638 = vmatpush3.bf16.msra.mxu0 %v677_v5  ;;  %s170_s22 = scalar_lea.vmem %s822_s3, %s605_s19 }
  0x10   : > { %v183_v10 = vld [vmem:[%s165_s27] sm:$0xf]  ;;  %v184_v11 = vld [vmem:[%s165_s27 + $0x4] sm:$0xf]  ;;  %639 = vmatprep.subr.bf16.mxu0 %v699_v1 }
  0x11   : > { %v188_v13 = vshrl.u32 %v183_v10, 16  ;;  %v191_v14 = vshll.u32 %v183_v10, 16  ;;  %v196_v15 = vshrl.u32 %v184_v11, 16  ;;  %v199_v17 = vshll.u32 %v184_v11, 16  ;;  %626 = vmatpush3.bf16.msra.mxu1 %v684_v20  ;;  %v209_v27 = vld [vmem:[#allocation2] sm:$0xf] }
  0x12   : > { %627 = vmatprep.subr.bf16.mxu1 %v699_v1  ;;  %v214_v29 = vld [vmem:[#allocation2 + $0x8] sm:$0x1] }
  0x13   : > { %v190_v18 = vrot.slane %v188_v13, 7  ;;  %v198_v19 = vrot.slane %v196_v15, 7  ;;  %640 = vmatpush3.bf16.msra.mxu0 %v679_v16 }
  0x14   : > { %645 = vmatprep.subr.bf16.mxu0 %v699_v1 }
  0x15   : > { %v193_v21 = vor.u32 %v191_v14, %v190_v18  ;;  %v194_v22 = vrot.slane %v190_v18, 4  ;;  %v201_v23 = vor.u32 %v199_v17, %v198_v19  ;;  %v203_v24 = vrot.slane %v198_v19, 4  ;;  %628 = vmatpush3.bf16.msra.mxu1 %v686_v25 }
  0x17   : > { %v202_v26 = vsel %vm186_vm8, %v194_v22, %v201_v23  ;;  %v210_v28 = vsel %vm208_vm9, %v193_v21, %v209_v27  ;;  %v215_v30 = vsel %vm761_vm3, %v203_v24, %v214_v29 }
  0x18   : > { %213 = vst.msk [vmem:[#allocation2 + $0x4] sm:$0xf] %vm207_vm7, %v202_v26  ;;  %211 = vst [vmem:[#allocation2] sm:$0xf] %v210_v28 }
  0x19   : > { %216 = vst [vmem:[#allocation2 + $0x8] sm:$0x1] %v215_v30 }
  0x1f   : > { %v311_v31 = vld [vmem:[#allocation2 + $0x4] sm:$0xf]  ;;  %v310_v32 = vld [vmem:[#allocation2] sm:$0xf] }
  0x20   : > { %v688_v33 = vld [vmem:[#allocation2] sm:$0xff]   ;;  %v581_v34 = vcombine.low %v310_v32, %v311_v31  ;;  %v682_v35 = vld [vmem:[#allocation2 + $0x8] ss:$0 sps:$4 sm:$0x11]  }
  0x21   : > { %630 = vmatmul.mubr.msk.bf16.vlgmr.msra.gmra.mrb[0].mxu1 %vm263_vm10, %v688_v33  ;;  %v339_v38 = vshll.u32 %v682_v35, 16  ;;  %v413_v45 = vld [vmem:[#allocation2] sm:$0xe]  ;;  %v428_v50 = vrot.slane %v682_v35, 1 }
  0x22   : > { %v332_v36 = vshrl.u32 %v581_v34, 16  ;;  %v334_v37 = vshll.u32 %v581_v34, 16  ;;  %v596_v47 = vcombine.low %v413_v45, %v311_v31 }
  0x23   : > { %v341_v40 = vrot.slane %v339_v38, 1 }
  0x24   : > { %v336_v39 = vrot.slane %v334_v37, 1  ;;  %v427_v49 = vrot.slane %v596_v47, 1 }
  0x26   : > { %v337_v41 = vor.u32 %v336_v39, %v332_v36  ;;  %v429_v51 = vsel %vm426_vm12, %v427_v49, %v428_v50 }
  0x28   : > { %v342_v43 = vsel %vm330_vm11, %v337_v41, %v341_v40 }
  0x29   : > { %642 = vmatmul.mubr.msk.bf16.vlgmr.msra.gmra.mrb[0].mxu0 %vm263_vm10, %v342_v43 }
  0x2a   : > { %646 = vmatpush3.bf16.msra.mxu0 %v683_v42  ;;  %653 = vmatprep.mubr.msk.bf16.mxu0 %vm700_vm0, %v699_v1 }
  0x2b   : > { %647 = vmatprep.subr.bf16.mxu0 %v699_v1 }
  0x2e   : > { %648 = vmatpush3.bf16.msra.mxu0 %v685_v44 }
  0x2f   : > { %649 = vmatprep.subr.bf16.mxu0 %v699_v1 }
  0x32   : > { %650 = vmatpush3.bf16.msra.mxu0 %v687_v46 }
  0x33   : > { %651 = vmatprep.subr.bf16.mxu0 %v699_v1 }
  0x36   : > { %652 = vmatpush3.bf16.msra.mxu0 %v689_v48 }
  0x39   : > { %654 = vmatmul.mubr.msk.bf16.vlgmr.msra.gmra.mrb[0].mxu0 %vm263_vm10, %v429_v51 }
  0xf4   : > { %v301_v52 = vpop.f32.mrb[0].mxu1 }
  0xf5   : > { %v631_v53 = vpop.f32.mrb[1].mxu1  ;;  %v308_v57 = vadd.f32 %v566_v56, %v301_v52 }
  0xf6   : > { %v304_v54 = vpop.f32.mrb[2].mxu1 }
  0xf7   : > { %v632_v55 = vpop.f32.mrb[3].mxu1  ;;  %v309_v59 = vadd.f32 %v566_v56, %v304_v54 }
 0x10c   : > { %v491_v58 = vpop.f32.mrb[0].mxu0 }
 0x10d   : > { %v658_v60 = vadd.f32 %v491_v58, %v308_v57  ;;  %v655_v61 = vpop.f32.mrb[1].mxu0 }
 0x10e   : > { %v494_v62 = vpop.f32.mrb[2].mxu0 }
 0x10f   : > { %500 = vst [vmem:[%s170_s22] sm:$0xff] %v658_v60  ;;  %v660_v63 = vadd.f32 %v494_v62, %v309_v59  ;;  %v656_v0 = vpop.f32.mrb[3].mxu0 }
 0x111   : > { %501 = vst [vmem:[%s170_s22 + $0x8] sm:$0xff] %v660_v63 }
 0x112 PF: > { %s13_s12 = sadd.s32 1, %s697_s12  }
 0x113   : > { %p10_p4 = scmp.ge.s32.totalorder %s13_s12, 4  }
 0x115   :  { %12 = sbr.rel (!%p10_p4) target bundleno = 1 (0x1), region = 64 }

</bundles_post_ra>
